<compile_context>
chip_gen: v5e
topology: v5e:2x2
jax: 0.10.0
libtpu: 0.0.40
codegen_flags: <defaults>
</compile_context>

<pallas_src>
import jax
import jax.numpy as jnp
from jax.experimental import pallas as pl
from jax.experimental.pallas import tpu as pltpu


def dueling_head_kernel(x_ref, w_ref, b_ref, q_ref):
    # Pure matmul + bias: all dueling algebra was folded into w/b at init time.
    out = jnp.dot(x_ref[...], w_ref[...], preferred_element_type=jnp.float32)
    q_ref[...] = (out + b_ref[...]).astype(q_ref.dtype)


def fold_dueling_params(wv, bv, wa, ba, *, dtype=jnp.float32):
    """Fold the dueling combination into a single weight/bias (call ONCE at init).

    q = x @ w_eff + b_eff  with
      w_eff = wa + wv - mean(wa, axis=1, keepdims=True)
      b_eff = ba + bv - mean(ba, axis=-1, keepdims=True)
    """
    wa32 = wa.astype(jnp.float32)
    ba32 = ba.astype(jnp.float32)
    w_eff = wa32 + wv.astype(jnp.float32) - jnp.mean(wa32, axis=1, keepdims=True)
    b_eff = ba32 + bv.astype(jnp.float32) - jnp.mean(ba32, axis=-1, keepdims=True)
    return w_eff.astype(dtype), b_eff.reshape(1, -1).astype(jnp.float32)


def _vmem_budget_bytes():
    # Per-generation cap: ~48 MiB on v7x (64 MiB/TC), ~96 MiB on v5e/v6e (128 MiB).
    try:
        cap = int(pltpu.get_tpu_info().vmem_capacity_bytes)
    except Exception:
        cap = 64 << 20  # conservative fallback
    return min(cap * 3 // 4, 100 << 20)


def dueling_head(x, w_eff, b_eff, *, block_b=None):
    """x: [B, E], w_eff: [E, A], b_eff: [1, A] (f32) -> q: [B, A] in x.dtype."""
    B, E = x.shape
    A = w_eff.shape[1]
    itemsize = jnp.dtype(x.dtype).itemsize
    out_itemsize = itemsize

    vmem_budget = _vmem_budget_bytes()

    # Batch tile derived from the VMEM budget (weight/bias single-buffered,
    # x/q tiles double-buffered), capped where per-step overhead is amortized.
    static_bytes = E * A * itemsize + A * 4
    per_row = 2 * E * itemsize + 2 * A * out_itemsize
    tm = max(8, (vmem_budget - static_bytes) // max(per_row, 1))
    tm = min(tm, 1024)
    if block_b is not None:
        tm = min(tm, int(block_b))
    if B > 8:
        # Keep >= 2 grid steps so "parallel" actually shards across v7x's 2 TCs.
        tm = min(tm, pl.cdiv(pl.cdiv(B, 2), 8) * 8)
    tm = min(tm, pl.cdiv(B, 8) * 8)          # don't exceed (sublane-rounded) B
    tm = max(8, (tm // 8) * 8)

    grid = (pl.cdiv(B, tm),)                 # ragged last block: no pad, no slice

    vmem_need = (
        static_bytes                         # resident weight + bias (1x buffered)
        + 2 * tm * E * itemsize              # double-buffered x tiles
        + 2 * tm * A * out_itemsize          # double-buffered q tiles
    )
    vmem_limit = int(min(max(2 * vmem_need, 32 << 20), vmem_budget))

    return pl.pallas_call(
        dueling_head_kernel,
        out_shape=jax.ShapeDtypeStruct((B, A), x.dtype),
        grid_spec=pltpu.PrefetchScalarGridSpec(
            num_scalar_prefetch=0,
            grid=grid,
            in_specs=[
                pl.BlockSpec((tm, E), lambda i: (i, 0)),        # x tile (pipelined)
                pl.BlockSpec((E, A), lambda i: (0, 0),
                             pipeline_mode=pl.Buffered(1)),     # folded weight (resident)
                pl.BlockSpec((1, A), lambda i: (0, 0),
                             pipeline_mode=pl.Buffered(1)),     # folded bias (resident)
            ],
            out_specs=pl.BlockSpec((tm, A), lambda i: (i, 0)),
        ),
        compiler_params=pltpu.CompilerParams(
            dimension_semantics=("parallel",),
            vmem_limit_bytes=vmem_limit,
        ),
        cost_estimate=pl.CostEstimate(
            flops=2 * B * E * A,
            transcendentals=0,
            bytes_accessed=(B * E * itemsize          # x read
                            + E * A * itemsize        # weight read
                            + A * 4                   # f32 bias read
                            + B * A * out_itemsize),  # q write
        ),
    )(x, w_eff, b_eff)


def init_params(key, embed_dim, num_actions, dtype=jnp.float32):
    """Deterministic init mimicking nn.Linear defaults (uniform +/- 1/sqrt(fan_in))."""
    k1, k2, k3, k4 = jax.random.split(key, 4)
    bound = 1.0 / jnp.sqrt(embed_dim)
    wv = jax.random.uniform(k1, (embed_dim, 1), dtype, -bound, bound)
    bv = jax.random.uniform(k2, (1, 1), dtype, -bound, bound)
    wa = jax.random.uniform(k3, (embed_dim, num_actions), dtype, -bound, bound)
    ba = jax.random.uniform(k4, (1, num_actions), dtype, -bound, bound)
    return wv, bv, wa, ba


def dueling_head_ref(x, wv, bv, wa, ba):
    value = x @ wv + bv
    advantage = x @ wa + ba
    return value + advantage - advantage.mean(axis=-1, keepdims=True)


if __name__ == "__main__":
    key = jax.random.PRNGKey(0)
    kx, kp, kx2 = jax.random.split(key, 3)

    # Small shapes matching the module's forward: batch=2, embed_dim=32, actions=8.
    B, E, A = 2, 32, 8
    x = jax.random.normal(kx, (B, E), jnp.float32)
    wv, bv, wa, ba = init_params(kp, E, A)

    # Fold the dueling algebra into the parameters once (init / param-update time).
    w_eff, b_eff = fold_dueling_params(wv, bv, wa, ba, dtype=x.dtype)

    q = jax.block_until_ready(dueling_head(x, w_eff, b_eff))
    q_ref = dueling_head_ref(x, wv, bv, wa, ba)
    assert q.shape == (B, A), q.shape
    assert jnp.allclose(q, q_ref, atol=5e-5, rtol=5e-5), jnp.max(jnp.abs(q - q_ref))

    # Second check: multi-tile batch grid + ragged last block (B % tm != 0),
    # no wrapper-side padding or slicing involved.
    B2 = 20
    x2 = jax.random.normal(kx2, (B2, E), jnp.float32)
    q2 = jax.block_until_ready(dueling_head(x2, w_eff, b_eff, block_b=8))
    q2_ref = dueling_head_ref(x2, wv, bv, wa, ba)
    assert q2.shape == (B2, A), q2.shape
    assert jnp.allclose(q2, q2_ref, atol=5e-5, rtol=5e-5), jnp.max(jnp.abs(q2 - q2_ref))

    print("KERNEL_OK")
</pallas_src>

<mosaic_0001>
module attributes {stable_mosaic.version = 11 : i64} {
  func.func @dueling_head_kernel(%arg0: i32, %arg1: memref<8x32xf32, #tpu.memory_space<vmem>>, %arg2: memref<32x8xf32, #tpu.memory_space<vmem>>, %arg3: memref<1x8xf32, #tpu.memory_space<vmem>>, %arg4: memref<8x8xf32, #tpu.memory_space<vmem>>) attributes {dimension_semantics = [#tpu.dimension_semantics<parallel>], iteration_bounds = array<i64: 1>, scalar_prefetch = 0 : i64, scratch_operands = 0 : i64, tpu.core_type = #tpu.core_type<tc>, window_params = [{transform_indices = @transform_0, window_bounds = array<i64: 8, 32>}, {pipeline_mode = #tpu.pipeline_mode<synchronous>, transform_indices = @transform_1, window_bounds = array<i64: 32, 8>}, {pipeline_mode = #tpu.pipeline_mode<synchronous>, transform_indices = @transform_2, window_bounds = array<i64: 1, 8>}, {transform_indices = @transform_3, window_bounds = array<i64: 8, 8>}]} {
    %c0 = arith.constant 0 : index
    %c0_0 = arith.constant 0 : index
    %0 = vector.load %arg1[%c0, %c0_0] : memref<8x32xf32, #tpu.memory_space<vmem>>, vector<8x32xf32>
    %c0_1 = arith.constant 0 : index
    %c0_2 = arith.constant 0 : index
    %1 = vector.load %arg2[%c0_1, %c0_2] : memref<32x8xf32, #tpu.memory_space<vmem>>, vector<32x8xf32>
    %cst = arith.constant dense<0.000000e+00> : vector<8x8xf32>
    %2 = tpu.matmul %0, %1, %cst {dimension_numbers = #tpu.dot_dimension_numbers<[1], [0], [0], [1], [0, 0, 1, 1], [], []>} : vector<8x32xf32>, vector<32x8xf32>, vector<8x8xf32> -> vector<8x8xf32>
    %c0_3 = arith.constant 0 : index
    %c0_4 = arith.constant 0 : index
    %3 = vector.load %arg3[%c0_3, %c0_4] : memref<1x8xf32, #tpu.memory_space<vmem>>, vector<1x8xf32>
    %4 = vector.broadcast %3 : vector<1x8xf32> to vector<8x8xf32>
    %5 = arith.addf %2, %4 : vector<8x8xf32>
    %c0_5 = arith.constant 0 : index
    %c0_6 = arith.constant 0 : index
    %6 = vector.load %arg4[%c0_5, %c0_6] : memref<8x8xf32, #tpu.memory_space<vmem>>, vector<8x8xf32>
    tpu.vector_store %arg4[%c0_5, %c0_6], %5 {strides = array<i32>} : memref<8x8xf32, #tpu.memory_space<vmem>>, vector<8x8xf32>,
    return
  }
  func.func @transform_0(%arg0: i32) -> (i32, i32) {
    %c0_i32 = arith.constant 0 : i32
    %c0_i32_0 = arith.constant 0 : i32
    return %arg0, %c0_i32 : i32, i32
  }
  func.func @transform_1(%arg0: i32) -> (i32, i32) {
    %c0_i32 = arith.constant 0 : i32
    %c0_i32_0 = arith.constant 0 : i32
    %c0_i32_1 = arith.constant 0 : i32
    return %c0_i32, %c0_i32_0 : i32, i32
  }
  func.func @transform_2(%arg0: i32) -> (i32, i32) {
    %c0_i32 = arith.constant 0 : i32
    %c0_i32_0 = arith.constant 0 : i32
    %c0_i32_1 = arith.constant 0 : i32
    return %c0_i32, %c0_i32_0 : i32, i32
  }
  func.func @transform_3(%arg0: i32) -> (i32, i32) {
    %c0_i32 = arith.constant 0 : i32
    %c0_i32_0 = arith.constant 0 : i32
    return %arg0, %c0_i32 : i32, i32
  }
}

</mosaic_0001>

<bundles_post_ra>
// kernel: tpu_custom_call.1
= control target key start
LH: loop header
LB: loop body
LE: loop exit
PB: predicated region body
PF: predicated region fallthrough
CT: control target
= control target key end

     0   :  { %8 = vsyncpa [#allocation3], 0  ;;  %vm24_vm0 = vcmask 261120   ;;  %vm48_vm1 = vcmask 64512   ;;  %s143_s0 = inlined_call_operand.vmem [shape: f32[2,32], index: 0, kind: input, shape index: {}]   ;;  %s144_s1 = inlined_call_operand.vmem [shape: f32[32,8], index: 1, kind: input, shape index: {}]   ;;  %s145_s2 = inlined_call_operand.vmem [shape: f32[1,8], index: 2, kind: input, shape index: {}]   ;;  %s146_s3 = inlined_call_operand.hbm [shape: f32[2,8], index: 3, kind: output, shape index: {}]  }
   0x1   :  { %v19_v0 = vld [vmem:[%s144_s1 + $0x18] sm:$0xff]  ;;  %v18_v1 = vld [vmem:[%s144_s1 + $0x10] sm:$0xff]  ;;  %v17_v2 = vld [vmem:[%s144_s1 + $0x8] sm:$0xff] }
   0x2   :  { %40 = vmatpush.msra.mxu0 %v19_v0  ;;  %v16_v3 = vld [vmem:[%s144_s1] sm:$0xff] }
   0x3   :  { %v15_v4 = vld [vmem:[%s143_s0] sm:$0xff] }
   0x4   :  { %41 = vmatpush.msra.mxu0 %v18_v1  ;;  %v72_v5 = vld [vmem:[%s145_s2] ss:$0 sm:$0xff] }
   0x6   :  { %42 = vmatpush.msra.mxu0 %v17_v2 }
   0x8   :  { %43 = vmatpush.msra.mxu0 %v16_v3 }
   0x9   :  { %68 = vmatmul.msk.f32.vlgmr.msra.gmra.mxu0 %vm24_vm0, %v15_v4 }
  0x86   :  { %v45_v6 = vpop.f32.mrf.mxu0 }
  0x87   :  { %v46_v7 = vadd.f32 %v72_v5, %v45_v6 }
  0x89   :  { %49 = vst.msk [vmem:[#allocation2] sm:$0xff] %vm48_vm1, %v46_v7 }
  0x8a   :  { %53 = vsyncadd [#allocation3], 96  ;;  %s56_s1 = sshll.u32 %s146_s3, 4  ;;  %s99_s26 = smov [#allocation2]   ;;  %s57_s1 = int_to_ptr.hbm [resolvable:$true] %s56_s1 }
  0x8b   :  { %s54_s27 = sshll.u32 %s99_s26, 4  ;;  %s100_s0 = smov 32   ;;  %s55_s27 = int_to_ptr.vmem [resolvable:$true] %s54_s27 }
  0x8c   :  { %s101_s28 = smov 2  }
  0x8d   :  { %62 = dma.vmem_to_hbm [thread:$0]  %s55_s27, 32, %s57_s1, [#allocation3], %s100_s0, %s100_s0, %s101_s28  }
  0x8e   :  { %97 = dma.done.wait [#allocation3], 128  }
  0x8f   :  { %98 = vsyncadd [#allocation3], 4294967168 }
  0x90   :  { %67 = vsyncpa [#allocation3], 1 }

</bundles_post_ra>
